<compile_context>
chip_gen: v5e
topology: v5e:2x2
jax: 0.10.0
libtpu: 0.0.40
codegen_flags: <defaults>
</compile_context>

<pallas_src>
import functools

import jax
import jax.numpy as jnp
from jax import lax
from jax.experimental import pallas as pl
from jax.experimental.pallas import tpu as pltpu


def _cdiv(a, b):
    return -(-a // b)


def _chip_caps():
    """Best-effort (vmem_capacity_bytes, tensorcores_per_chip) with safe fallbacks."""
    vmem_cap = 64 * 1024 * 1024          # conservative: v7x has the smallest VMEM
    cores = 1
    try:
        info = pltpu.get_tpu_info()
        cap = int(getattr(info, "vmem_capacity_bytes", 0) or 0)
        if cap > 0:
            vmem_cap = cap
    except Exception:
        pass
    try:
        kind = jax.devices()[0].device_kind.lower()
        if "7" in kind:                  # v7x: 2 TensorCores per chip share the grid
            cores = 2
    except Exception:
        pass
    return vmem_cap, cores


def _mse_kernel(pred_ref, label_ref, out_ref, acc_ref, *,
                inv_d, r_valid, tr, mask_rows):
    """Block (bn, tr, lanes). Grid = (sample_blocks [parallel], row_tiles [reduction])."""
    k = pl.program_id(1)
    last = pl.num_programs(1) - 1

    @pl.when(k == 0)
    def _():
        acc_ref[...] = jnp.zeros_like(acc_ref)

    diff = pred_ref[...].astype(jnp.float32) - label_ref[...].astype(jnp.float32)
    sq = diff * diff

    def accumulate(x):
        # Per-step reduce into a per-sample scalar: rows/sublanes first (mostly
        # VPU vreg+vreg adds), then one cross-lane XLU reduce per sample group.
        # The tiny accumulator avoids any full-block read-modify-write traffic.
        s = jnp.sum(x, axis=1, keepdims=True)    # (bn, 1, lanes)
        s = jnp.sum(s, axis=2, keepdims=True)    # (bn, 1, 1)
        acc_ref[...] += s

    if mask_rows:
        # Only the last row-tile is ragged; keep the mask off the hot path.
        @pl.when(k != last)
        def _():
            accumulate(sq)

        @pl.when(k == last)
        def _():
            rows = lax.broadcasted_iota(jnp.int32, sq.shape, 1) + k * tr
            accumulate(jnp.where(rows < r_valid, sq, 0.0))
    else:
        accumulate(sq)

    @pl.when(k == last)
    def _():
        out_ref[...] = (acc_ref[...] * inv_d).reshape(out_ref.shape)


def mse_loss(pred, label, *, target_block_bytes=None):
    """Per-sample MSE, equivalent to torch.mean((pred - label.view_as(pred))**2, dims != 0)."""
    n = pred.shape[0]
    d = 1
    for s in pred.shape[1:]:
        d *= s
    assert label.size == n * d, "label must be reshapeable to pred's shape"

    vmem_cap, cores = _chip_caps()

    # ---- lane layout --------------------------------------------------------
    if d % 128 == 0:
        lanes = 128
    else:
        # Bounded fallback: largest divisor of d in [128, 8192] keeps blocks
        # bounded and lane-dense-ish even for large non-128-divisible d.
        lanes = d
        for cand in range(min(d, 8192), 127, -1):
            if d % cand == 0:
                lanes = cand
                break
        # TODO(synk): true lane tiling with an in-kernel column mask for huge
        # prime-ish d (currently falls back to one full-d row per sample).
    r = d // lanes

    # torch: label.view(pred.size()); these reshapes are free (contiguous views).
    pred3 = pred.reshape(n, r, lanes)
    label3 = label.reshape(n, r, lanes)

    # ---- block-shape selection (HBM-byte budget per input block) ------------
    itemsize = max(pred.dtype.itemsize, label.dtype.itemsize)
    if target_block_bytes is None:
        target_block_bytes = (8 * 1024 * 1024 if vmem_cap <= 96 * 1024 * 1024
                              else 16 * 1024 * 1024)
    # never let 2 inputs x 2 pipeline buffers exceed ~3/4 of physical VMEM
    target_block_bytes = min(target_block_bytes, max(1 << 20, (vmem_cap * 3) // 16))
    budget_elems = max(1, target_block_bytes // itemsize)

    tr = max(1, min(r, budget_elems // lanes))     # row-tile size (bn == 1)
    if tr < r:
        tr = min(r, max(8, (tr // 8) * 8))         # sublane-aligned, or full r
    bn = 1
    if tr == r:
        # Whole per-sample matrix fits in one tile: batch samples into the block.
        bn = max(1, min(n, budget_elems // max(1, r * lanes)))

    n_blocks = _cdiv(n, bn)

    # Megacore-aware block count: only split the sample axis on multi-TC chips.
    if cores >= 2 and n >= 2:
        if n_blocks < 2:
            bn = _cdiv(n, 2)
            n_blocks = _cdiv(n, bn)
        elif n_blocks % 2 == 1:
            bn_even = _cdiv(n, n_blocks + 1)
            if _cdiv(n, bn_even) % 2 == 0:
                bn = bn_even
                n_blocks = _cdiv(n, bn)
    # TODO(synk): on v7x with n == 1, additionally split the feature reduction
    # 2-way across a leading parallel axis and combine the partials in the wrapper.

    k_tiles = _cdiv(r, tr)
    mask_rows = (r % tr) != 0

    # ---- VMEM limit from actual usage ---------------------------------------
    in_block_bytes = bn * tr * lanes * (pred.dtype.itemsize + label.dtype.itemsize)
    vmem_needed = 2 * in_block_bytes + 3 * 4096     # 2x-buffered inputs + out + acc (padded)
    vmem_limit = int(min(max(vmem_needed + (4 << 20), 16 << 20), vmem_cap))

    kernel = functools.partial(
        _mse_kernel, inv_d=1.0 / float(d), r_valid=r, tr=tr, mask_rows=mask_rows)

    out = pl.pallas_call(
        kernel,
        out_shape=jax.ShapeDtypeStruct((n_blocks, bn, 1), jnp.float32),
        grid_spec=pltpu.PrefetchScalarGridSpec(
            num_scalar_prefetch=0,
            grid=(n_blocks, k_tiles),
            in_specs=[
                pl.BlockSpec((bn, tr, lanes), lambda i, k: (i, k, 0)),
                pl.BlockSpec((bn, tr, lanes), lambda i, k: (i, k, 0)),
            ],
            out_specs=pl.BlockSpec((1, bn, 1), lambda i, k: (i, 0, 0)),
            scratch_shapes=[pltpu.VMEM((bn, 1, 1), jnp.float32)],
        ),
        compiler_params=pltpu.CompilerParams(
            dimension_semantics=("parallel", "arbitrary"),
            vmem_limit_bytes=vmem_limit,
        ),
    )(pred3, label3)

    # Invariant: the reduction never mixes sample rows, so garbage rows of a
    # ragged last sample block (n % bn != 0) stay confined to their own output
    # slots and are dropped by the [:n] slice below.
    return out.reshape(n_blocks * bn)[:n]


if __name__ == "__main__":
    key = jax.random.PRNGKey(0)
    k1, k2, k3, k4, k5, k6 = jax.random.split(key, 6)

    # Case 1: canonical NCHW image batch (d = 1024, 128-divisible).
    N, C, H, W = 2, 4, 16, 16
    pred = jax.random.normal(k1, (N, C, H, W), dtype=jnp.float32)
    label = jax.random.normal(k2, (N, C * H * W), dtype=jnp.float32)  # .view'd to pred shape
    out = jax.block_until_ready(mse_loss(pred, label))
    ref = jnp.mean((pred - label.reshape(pred.shape)) ** 2, axis=(1, 2, 3))
    assert out.shape == (N,)
    assert jnp.allclose(out, ref, rtol=1e-5, atol=1e-5), (out, ref)

    # Case 2: force a multi-tile reduction with a ragged last row-tile (r=20, tr=8).
    pred2 = jax.random.normal(k3, (2, 20, 8, 16), dtype=jnp.float32)
    label2 = jax.random.normal(k4, (2, 20, 8, 16), dtype=jnp.float32)
    out2 = jax.block_until_ready(mse_loss(pred2, label2, target_block_bytes=4096))
    ref2 = jnp.mean((pred2 - label2) ** 2, axis=(1, 2, 3))
    assert jnp.allclose(out2, ref2, rtol=1e-5, atol=1e-5), (out2, ref2)

    # Case 3: feature count not divisible by 128 (divisor-lane fallback) + batched samples.
    pred3 = jax.random.normal(k5, (3, 4, 9, 7), dtype=jnp.float32)
    label3 = jax.random.normal(k6, (3, 4 * 9 * 7), dtype=jnp.float32)
    out3 = jax.block_until_ready(mse_loss(pred3, label3))
    ref3 = jnp.mean((pred3 - label3.reshape(pred3.shape)) ** 2, axis=(1, 2, 3))
    assert jnp.allclose(out3, ref3, rtol=1e-5, atol=1e-5), (out3, ref3)

    print("KERNEL_OK")
</pallas_src>

<mosaic_0001>
module attributes {stable_mosaic.version = 11 : i64} {
  func.func @_mse_kernel(%arg0: i32, %arg1: i32, %arg2: memref<2x8x128xf32, #tpu.memory_space<vmem>>, %arg3: memref<2x8x128xf32, #tpu.memory_space<vmem>>, %arg4: memref<1x2x1xf32, #tpu.memory_space<vmem>>, %arg5: memref<2x1x1xf32, #tpu.memory_space<vmem>>) attributes {dimension_semantics = [#tpu.dimension_semantics<parallel>, #tpu.dimension_semantics<arbitrary>], iteration_bounds = array<i64: 1, 1>, scalar_prefetch = 0 : i64, scratch_operands = 1 : i64, tpu.core_type = #tpu.core_type<tc>, window_params = [{transform_indices = @transform_0, window_bounds = array<i64: 2, 8, 128>}, {transform_indices = @transform_1, window_bounds = array<i64: 2, 8, 128>}, {transform_indices = @transform_2, window_bounds = array<i64: 1, 2, 1>}]} {
    %c0_i32 = arith.constant 0 : i32
    %0 = arith.cmpi eq, %arg1, %c0_i32 : i32
    %1 = arith.extui %0 : i1 to i32
    %c0_i32_0 = arith.constant 0 : i32
    %2 = arith.cmpi ne, %1, %c0_i32_0 : i32
    scf.if %2 {
      %cst_15 = arith.constant 0.000000e+00 : f32
      %17 = vector.broadcast %cst_15 : f32 to vector<2x1x1xf32>
      %c0_16 = arith.constant 0 : index
      %c0_17 = arith.constant 0 : index
      %c0_18 = arith.constant 0 : index
      %18 = vector.load %arg5[%c0_16, %c0_17, %c0_18] : memref<2x1x1xf32, #tpu.memory_space<vmem>>, vector<2x1x1xf32>
      tpu.vector_store %arg5[%c0_16, %c0_17, %c0_18], %17 {strides = array<i32>} : memref<2x1x1xf32, #tpu.memory_space<vmem>>, vector<2x1x1xf32>,
    } else {
    }
    %c0 = arith.constant 0 : index
    %c0_1 = arith.constant 0 : index
    %c0_2 = arith.constant 0 : index
    %3 = vector.load %arg2[%c0, %c0_1, %c0_2] : memref<2x8x128xf32, #tpu.memory_space<vmem>>, vector<2x8x128xf32>
    %c0_3 = arith.constant 0 : index
    %c0_4 = arith.constant 0 : index
    %c0_5 = arith.constant 0 : index
    %4 = vector.load %arg3[%c0_3, %c0_4, %c0_5] : memref<2x8x128xf32, #tpu.memory_space<vmem>>, vector<2x8x128xf32>
    %5 = arith.subf %3, %4 : vector<2x8x128xf32>
    %6 = arith.mulf %5, %5 : vector<2x8x128xf32>
    %cst = arith.constant dense<0.000000e+00> : vector<2x128xf32>
    %7 = vector.multi_reduction <add>, %6, %cst [1] : vector<2x8x128xf32> to vector<2x128xf32>
    %8 = vector.shape_cast %7 : vector<2x128xf32> to vector<2x1x128xf32>
    %cst_6 = arith.constant dense<0.000000e+00> : vector<2x1xf32>
    %9 = vector.multi_reduction <add>, %8, %cst_6 [2] : vector<2x1x128xf32> to vector<2x1xf32>
    %10 = vector.shape_cast %9 : vector<2x1xf32> to vector<2x1x1xf32>
    %c0_7 = arith.constant 0 : index
    %c0_8 = arith.constant 0 : index
    %c0_9 = arith.constant 0 : index
    %11 = vector.load %arg5[%c0_7, %c0_8, %c0_9] : memref<2x1x1xf32, #tpu.memory_space<vmem>>, vector<2x1x1xf32>
    %12 = arith.addf %11, %10 : vector<2x1x1xf32>
    %c0_10 = arith.constant 0 : index
    %c0_11 = arith.constant 0 : index
    %c0_12 = arith.constant 0 : index
    %13 = vector.load %arg5[%c0_10, %c0_11, %c0_12] : memref<2x1x1xf32, #tpu.memory_space<vmem>>, vector<2x1x1xf32>
    tpu.vector_store %arg5[%c0_10, %c0_11, %c0_12], %12 {strides = array<i32>} : memref<2x1x1xf32, #tpu.memory_space<vmem>>, vector<2x1x1xf32>,
    %c0_i32_13 = arith.constant 0 : i32
    %14 = arith.cmpi eq, %arg1, %c0_i32_13 : i32
    %15 = arith.extui %14 : i1 to i32
    %c0_i32_14 = arith.constant 0 : i32
    %16 = arith.cmpi ne, %15, %c0_i32_14 : i32
    scf.if %16 {
      %c0_15 = arith.constant 0 : index
      %c0_16 = arith.constant 0 : index
      %c0_17 = arith.constant 0 : index
      %17 = vector.load %arg5[%c0_15, %c0_16, %c0_17] : memref<2x1x1xf32, #tpu.memory_space<vmem>>, vector<2x1x1xf32>
      %cst_18 = arith.constant 9.765625E-4 : f32
      %18 = vector.broadcast %cst_18 : f32 to vector<2x1x1xf32>
      %19 = arith.mulf %17, %18 : vector<2x1x1xf32>
      %20 = vector.shape_cast %19 : vector<2x1x1xf32> to vector<1x2x1xf32>
      %c0_19 = arith.constant 0 : index
      %c0_20 = arith.constant 0 : index
      %c0_21 = arith.constant 0 : index
      %21 = vector.load %arg4[%c0_19, %c0_20, %c0_21] : memref<1x2x1xf32, #tpu.memory_space<vmem>>, vector<1x2x1xf32>
      tpu.vector_store %arg4[%c0_19, %c0_20, %c0_21], %20 {strides = array<i32>} : memref<1x2x1xf32, #tpu.memory_space<vmem>>, vector<1x2x1xf32>,
    } else {
    }
    return
  }
  func.func @transform_0(%arg0: i32, %arg1: i32) -> (i32, i32, i32) {
    %c0_i32 = arith.constant 0 : i32
    %c0_i32_0 = arith.constant 0 : i32
    return %arg0, %arg1, %c0_i32 : i32, i32, i32
  }
  func.func @transform_1(%arg0: i32, %arg1: i32) -> (i32, i32, i32) {
    %c0_i32 = arith.constant 0 : i32
    %c0_i32_0 = arith.constant 0 : i32
    return %arg0, %arg1, %c0_i32 : i32, i32, i32
  }
  func.func @transform_2(%arg0: i32, %arg1: i32) -> (i32, i32, i32) {
    %c0_i32 = arith.constant 0 : i32
    %c0_i32_0 = arith.constant 0 : i32
    %c0_i32_1 = arith.constant 0 : i32
    return %arg0, %c0_i32, %c0_i32_0 : i32, i32, i32
  }
}

</mosaic_0001>

<bundles_post_ra>
// kernel: tpu_custom_call.1
= control target key start
LH: loop header
LB: loop body
LE: loop exit
PB: predicated region body
PF: predicated region fallthrough
CT: control target
= control target key end

     0   :  { %7 = vsyncpa [#allocation4], 0  ;;  %s193_s0 = inlined_call_operand.hbm [shape: f32[2,8,128], index: 0, kind: input, shape index: {}]   ;;  %s194_s1 = inlined_call_operand.hbm [shape: f32[2,8,128], index: 1, kind: input, shape index: {}]   ;;  %s195_s2 = inlined_call_operand.vmem [shape: f32[1,2,1], index: 2, kind: output, shape index: {}]  }
   0x1   :  { %s13_s11 = sshll.u32 %s193_s0, 4  ;;  %s14_s11 = int_to_ptr.hbm [resolvable:$true] %s13_s11 }
   0x2   :  { %8 = vsyncpa [#allocation6], 0  ;;  %s160_s12 = smov [#allocation3]   ;;  %s26_s16 = sshll.u32 %s194_s1, 4  ;;  %s27_s16 = int_to_ptr.hbm [resolvable:$true] %s26_s16 }
   0x3   :  { %s15_s13 = sshll.u32 %s160_s12, 4  ;;  %s161_s17 = smov 128   ;;  %s16_s13 = int_to_ptr.vmem [resolvable:$true] %s15_s13 }
   0x4   :  { %s162_s18 = smov 8   ;;  %s163_s19 = smov [#allocation5]  }
   0x5   :  { %21 = dma.hbm_to_vmem [thread:$0]  %s14_s11, 256, %s16_s13, [#allocation4], %s161_s17, %s161_s17, %s162_s18  }
   0x6   :  { %s28_s20 = sshll.u32 %s163_s19, 4  ;;  %s29_s20 = int_to_ptr.vmem [resolvable:$true] %s28_s20 }
   0x7   :  { %34 = dma.hbm_to_vmem [thread:$0]  %s27_s16, 256, %s29_s20, [#allocation6], %s161_s17, %s161_s17, %s162_s18  }
   0x8   :  { %156 = dma.done.wait [#allocation4], 256  }
   0x9   :  { %157 = vsyncadd [#allocation4], 4294967040 }
   0xa   :  { %158 = dma.done.wait [#allocation6], 256  }
   0xb   :  { %159 = vsyncadd [#allocation6], 4294967040  ;;  %vm47_vm0 = vcmask 0   ;;  %v164_v0 = vmov 0.0   ;;  %v50_v1 = vld [vmem:[#allocation3] sm:$0xff]  ;;  %v52_v2 = vld [vmem:[#allocation5] sm:$0xff] }
   0xc   :  { %48 = vst.msk [vmem:[#allocation2] sm:$0x1] %vm47_vm0, %v164_v0  ;;  %v51_v3 = vld [vmem:[#allocation3 + $0x8] sm:$0xff]  ;;  %v54_v4 = vsub.f32 %v50_v1, %v52_v2  ;;  %v53_v5 = vld [vmem:[#allocation5 + $0x8] sm:$0xff]  ;;  %vm95_vm1 = vcmask 1024  }
   0xd   :  { %49 = vst.msk [vmem:[#allocation2 + $0x1] sm:$0x1] %vm47_vm0, %v164_v0  ;;  %v55_v6 = vsub.f32 %v51_v3, %v53_v5 }
   0xe   :  { %v56_v7 = vmul.f32 %v54_v4, %v54_v4 }
   0xf   :  { %v57_v8 = vmul.f32 %v55_v6, %v55_v6 }
  0x10   :  { %v58_v9 = vrot.slane %v56_v7, 4 }
  0x11   :  { %v64_v10 = vrot.slane %v57_v8, 4 }
  0x12   :  { %v59_v11 = vadd.f32 %v58_v9, %v56_v7 }
  0x13   :  { %v65_v12 = vadd.f32 %v64_v10, %v57_v8  ;;  %v74_v21 = vld [vmem:[#allocation2] sm:$0x1] }
  0x14   :  { %v60_v13 = vrot.slane %v59_v11, 2  ;;  %v75_v24 = vld [vmem:[#allocation2 + $0x1] sm:$0x1] }
  0x15   :  { %v66_v14 = vrot.slane %v65_v12, 2 }
  0x16   :  { %v61_v15 = vadd.f32 %v60_v13, %v59_v11 }
  0x17   :  { %v67_v17 = vadd.f32 %v66_v14, %v65_v12 }
  0x18   :  { %v62_v16 = vrot.slane %v61_v15, 1 }
  0x19   :  { %v68_v19 = vrot.slane %v67_v17, 1 }
  0x1a   :  { %v63_v18 = vadd.f32 %v62_v16, %v61_v15 }
  0x1b   :  { %v69_v20 = vadd.f32 %v68_v19, %v67_v17 }
  0x1c   :  { %70 = vadd.xlane.f32.xlu0 %v63_v18 }
  0x24   :  { %72 = vadd.xlane.f32.xlu0 %v69_v20 }
  0x8f   :  { %v71_v22 = vpop.xlane.xlu0 %70 }
  0x90   :  { %v76_v23 = vadd.f32 %v74_v21, %v71_v22 }
  0x92   :  { %79 = vst.msk [vmem:[#allocation2] sm:$0x1] %vm47_vm0, %v76_v23 }
  0x97   :  { %v73_v25 = vpop.xlane.xlu0 %72 }
  0x98   :  { %v77_v26 = vadd.f32 %v75_v24, %v73_v25 }
  0x99   :  { %v84_v27 = vld [vmem:[#allocation2] sm:$0x1] }
  0x9a   :  { %v86_v28 = vmul.f32 0.0009765625, %v84_v27  ;;  %80 = vst.msk [vmem:[#allocation2 + $0x1] sm:$0x1] %vm47_vm0, %v77_v26 }
  0x9c   :  { %90 = vst [vmem:[#allocation1] ss:$9 sm:$0xff] %v86_v28 }
  0xa1   :  { %v85_v29 = vld [vmem:[#allocation2 + $0x1] sm:$0x1] }
  0xa2   :  { %v87_v30 = vmul.f32 0.0009765625, %v85_v29 }
  0xa4   :  { %92 = vst [vmem:[#allocation1 + $0x1] ss:$9 sm:$0xff] %v87_v30 }
  0xab   :  { %v93_v31 = vld [vmem:[#allocation1] sm:$0xff] }
  0xac   :  { %96 = vst.msk [vmem:[%s195_s2] sm:$0x3] %vm95_vm1, %v93_v31 }
  0xad   :  { %101 = vsyncpa [#allocation4], 1 }
  0xae   :  { %102 = vsyncpa [#allocation6], 1 }

</bundles_post_ra>
